<compile_context>
chip_gen: v6e
topology: v6e:2x2x1
jax: 0.10.0
libtpu: 0.0.40
codegen_flags: <defaults>
</compile_context>

<pallas_src>
import math
import string

import jax
import jax.numpy as jnp
from jax import lax
from jax.experimental import pallas as pl
from jax.experimental.pallas import tpu as pltpu

all_letters = string.ascii_letters + " .,;'"
n_letters = len(all_letters)      # 57
n_hidden = 128
n_categories = 18                 # e.g. 18 language classes in the tutorial

_NEG = -1e30                      # fill value for padded logit lanes
BP = 8                            # padded batch (one full sublane); tutorial B = 1


def letterToIndex(letter):
    return all_letters.find(letter)


def lineToIndices(line):
    # single device transfer instead of T scatter dispatches
    return jnp.asarray([letterToIndex(c) for c in line], dtype=jnp.int32)


def lineToTensor(line):
    # kept for parity with the PyTorch helper (used only by the reference)
    idx = lineToIndices(line)
    return jax.nn.one_hot(idx, n_letters, dtype=jnp.float32)[:, None, :]


def _round_up(x, m):
    return (x + m - 1) // m * m


def _rnn_seq_kernel(idx_ref, h0_ref, tbl_ref, w_hid_ref,
                    out_ref, h_out_ref, logits_scr):
    """Whole sequence in one kernel invocation (grid=(1,)).

    idx_ref   : (T,) int32 SMEM     letter index per timestep (scalar prefetch)
    h0_ref    : (Bp, H)             initial hidden
    tbl_ref   : (n_letters, Bp, F)  per-letter input contribution + fused bias
    w_hid_ref : (H, F)              fused [i2h | i2o] weights, hidden half
    out_ref   : (T, Bp, OP)         per-step log-softmax (lane-dense, padded)
    h_out_ref : (Bp, H)             final hidden state
    logits_scr: (T, Bp, OP) VMEM    raw logits slab (softmax deferred)
    """
    H = h0_ref.shape[1]
    T = out_ref.shape[0]

    def step(t, h):
        # one-hot matmul == row lookup; bias already folded into the table row
        contrib = tbl_ref[idx_ref[t]]                       # (Bp, F)
        f = jnp.dot(h, w_hid_ref[...],
                    preferred_element_type=jnp.float32) + contrib
        logits_scr[t] = f[:, H:]                            # raw logits, padded lanes ~ -1e30
        return f[:, :H]                                     # new hidden (lane-aligned slice)

    h_final = lax.fori_loop(0, T, step, h0_ref[...], unroll=(T <= 16))
    h_out_ref[...] = h_final

    # vectorized log-softmax epilogue over the whole (T, Bp, OP) slab;
    # padded lanes hold ~-1e30 -> never selected by max, exp underflows to 0.
    lg = logits_scr[...]
    m = jnp.max(lg, axis=-1, keepdims=True)
    sh = lg - m
    out_ref[...] = sh - jnp.log(jnp.sum(jnp.exp(sh), axis=-1, keepdims=True))


def prepare_fused_params(w_ih, b_ih, w_io, b_io, input_size=n_letters, bp=BP):
    """Build the per-letter input table and the fused hidden-half weights.

    w_ih: (input_size + H, H), w_io: (input_size + H, O), both stored as
    (in_features, out_features) = W_pytorch.T.  Done once, outside the kernel.
    """
    H = w_ih.shape[1]
    O = w_io.shape[1]
    o_pad = _round_up(O, 128)                 # 18 -> 128 (lane-dense output)
    fused = H + o_pad                         # 256

    # fused [i2h | i2o] weights for the hidden half of `combined`
    w_hid = jnp.zeros((H, fused), jnp.float32)
    w_hid = w_hid.at[:, :H].set(w_ih[input_size:])
    w_hid = w_hid.at[:, H:H + O].set(w_io[input_size:])

    # fused bias; padded logit lanes get -1e30 so they vanish in log-softmax
    b = jnp.full((fused,), _NEG, jnp.float32)
    b = b.at[:H].set(b_ih.reshape(-1))
    b = b.at[H:H + O].set(b_io.reshape(-1))

    # per-letter input contribution (rows of the input half of [i2h | i2o]),
    # bias folded in, pre-broadcast over the padded batch sublanes.
    rows = jnp.zeros((input_size, fused), jnp.float32)
    rows = rows.at[:, :H].set(w_ih[:input_size])
    rows = rows.at[:, H:H + O].set(w_io[:input_size])
    table = jnp.broadcast_to((rows + b[None, :])[:, None, :],
                             (input_size, bp, fused))
    return jnp.asarray(table), w_hid


@jax.jit
def rnn_sequence_forward(indices, hidden0, table, w_hid):
    """Run the whole character sequence in a single Pallas kernel.

    indices: (T,) int32 letter indices
    hidden0: (B, n_hidden)
    Returns (per-step log-softmax outputs (T, B, n_categories), final hidden).
    """
    T = indices.shape[0]
    B, H = hidden0.shape
    n_let, Bp, fused = table.shape
    o_pad = fused - H

    # pad batch to a full sublane (pure layout plumbing; padded rows sliced off)
    h0 = jnp.zeros((Bp, H), jnp.float32).at[:B].set(hidden0)

    grid_spec = pltpu.PrefetchScalarGridSpec(
        num_scalar_prefetch=1,                # letter indices -> SMEM
        grid=(1,),                            # whole recurrence in one invocation
        in_specs=[
            pl.BlockSpec((Bp, H), lambda i, idx: (0, 0)),              # hidden0
            pl.BlockSpec((n_let, Bp, fused), lambda i, idx: (0, 0, 0)),  # letter table
            pl.BlockSpec((H, fused), lambda i, idx: (0, 0)),           # fused W_hid
        ],
        out_specs=(
            pl.BlockSpec((T, Bp, o_pad), lambda i, idx: (0, 0, 0)),    # log-softmax outputs
            pl.BlockSpec((Bp, H), lambda i, idx: (0, 0)),              # final hidden
        ),
        scratch_shapes=[pltpu.VMEM((T, Bp, o_pad), jnp.float32)],      # raw logits slab
    )

    out_pad, h_out = pl.pallas_call(
        _rnn_seq_kernel,
        grid_spec=grid_spec,
        out_shape=(
            jax.ShapeDtypeStruct((T, Bp, o_pad), jnp.float32),
            jax.ShapeDtypeStruct((Bp, H), jnp.float32),
        ),
        compiler_params=pltpu.CompilerParams(
            dimension_semantics=("arbitrary",),     # serial recurrence
        ),
    )(indices, h0, table, w_hid)

    return out_pad[:, :B, :n_categories], h_out[:B]


def init_params(key, input_size, hidden_size, output_size):
    """Deterministic params, PyTorch nn.Linear-style uniform init.

    Weights stored as (in_features, out_features) = W_pytorch.T
    """
    k1, k2, k3, k4 = jax.random.split(key, 4)
    fan_in = input_size + hidden_size
    bound = 1.0 / math.sqrt(fan_in)
    w_ih = jax.random.uniform(k1, (fan_in, hidden_size), jnp.float32, -bound, bound)
    b_ih = jax.random.uniform(k2, (1, hidden_size), jnp.float32, -bound, bound)
    w_io = jax.random.uniform(k3, (fan_in, output_size), jnp.float32, -bound, bound)
    b_io = jax.random.uniform(k4, (1, output_size), jnp.float32, -bound, bound)
    return w_ih, b_ih, w_io, b_io


if __name__ == "__main__":
    key = jax.random.PRNGKey(0)
    w_ih, b_ih, w_io, b_io = init_params(key, n_letters, n_hidden, n_categories)
    table, w_hid = prepare_fused_params(w_ih, b_ih, w_io, b_io)

    # Same usage as the tutorial: the letters of 'Abe'.
    line = "Abe"
    indices = lineToIndices(line)                         # (3,) int32
    hidden0 = jnp.zeros((1, n_hidden), jnp.float32)

    outputs, hidden = rnn_sequence_forward(indices, hidden0, table, w_hid)
    outputs = jax.block_until_ready(outputs)
    hidden = jax.block_until_ready(hidden)

    # pure-JAX reference of the original per-step PyTorch module
    def _reference(idx, h, w_ih, b_ih, w_io, b_io):
        seq = jax.nn.one_hot(idx, n_letters, dtype=jnp.float32)[:, None, :]
        outs = []
        for t in range(seq.shape[0]):
            combined = jnp.concatenate([seq[t], h], axis=1)
            h = combined @ w_ih + b_ih
            logits = combined @ w_io + b_io
            outs.append(jax.nn.log_softmax(logits, axis=1))
        return jnp.stack(outs), h

    ref_out, ref_h = _reference(indices, hidden0, w_ih, b_ih, w_io, b_io)

    assert outputs.shape == (3, 1, n_categories), outputs.shape
    assert hidden.shape == (1, n_hidden), hidden.shape
    prob_sum = float(jnp.sum(jnp.exp(outputs[-1])))
    assert abs(prob_sum - 1.0) < 1e-4, prob_sum
    assert jnp.allclose(outputs, ref_out, atol=1e-4, rtol=1e-4), \
        float(jnp.max(jnp.abs(outputs - ref_out)))
    assert jnp.allclose(hidden, ref_h, atol=1e-4, rtol=1e-4), \
        float(jnp.max(jnp.abs(hidden - ref_h)))

    print("KERNEL_OK")
</pallas_src>

<mosaic_0001>
module attributes {stable_mosaic.version = 11 : i64} {
  func.func @_rnn_seq_kernel(%arg0: i32, %arg1: memref<3xi32, #tpu.memory_space<smem>>, %arg2: memref<8x128xf32, #tpu.memory_space<vmem>>, %arg3: memref<57x8x256xf32, #tpu.memory_space<vmem>>, %arg4: memref<128x256xf32, #tpu.memory_space<vmem>>, %arg5: memref<3x8x128xf32, #tpu.memory_space<vmem>>, %arg6: memref<8x128xf32, #tpu.memory_space<vmem>>, %arg7: memref<3x8x128xf32, #tpu.memory_space<vmem>>) attributes {dimension_semantics = [#tpu.dimension_semantics<arbitrary>], iteration_bounds = array<i64: 1>, scalar_prefetch = 1 : i64, scratch_operands = 1 : i64, tpu.core_type = #tpu.core_type<tc>, window_params = [{pipeline_mode = #tpu.pipeline_mode<synchronous>, transform_indices = @transform_0, window_bounds = array<i64: 8, 128>}, {pipeline_mode = #tpu.pipeline_mode<synchronous>, transform_indices = @transform_1, window_bounds = array<i64: 57, 8, 256>}, {pipeline_mode = #tpu.pipeline_mode<synchronous>, transform_indices = @transform_2, window_bounds = array<i64: 128, 256>}, {pipeline_mode = #tpu.pipeline_mode<synchronous>, transform_indices = @transform_3, window_bounds = array<i64: 3, 8, 128>}, {pipeline_mode = #tpu.pipeline_mode<synchronous>, transform_indices = @transform_4, window_bounds = array<i64: 8, 128>}]} {
    %c0 = arith.constant 0 : index
    %c0_0 = arith.constant 0 : index
    %0 = vector.load %arg2[%c0, %c0_0] : memref<8x128xf32, #tpu.memory_space<vmem>>, vector<8x128xf32>
    %c0_i32 = arith.constant 0 : i32
    %1 = arith.index_cast %c0_i32 : i32 to index
    %2 = memref.load %arg1[%1] : memref<3xi32, #tpu.memory_space<smem>>
    %3 = arith.index_cast %2 : i32 to index
    %c0_1 = arith.constant 0 : index
    %c0_2 = arith.constant 0 : index
    %4 = vector.load %arg3[%3, %c0_1, %c0_2] : memref<57x8x256xf32, #tpu.memory_space<vmem>>, vector<1x8x256xf32>
    %5 = vector.shape_cast %4 : vector<1x8x256xf32> to vector<8x256xf32>
    %c0_3 = arith.constant 0 : index
    %c0_4 = arith.constant 0 : index
    %6 = vector.load %arg4[%c0_3, %c0_4] : memref<128x256xf32, #tpu.memory_space<vmem>>, vector<128x256xf32>
    %cst = arith.constant dense<0.000000e+00> : vector<8x256xf32>
    %7 = tpu.matmul %0, %6, %cst {dimension_numbers = #tpu.dot_dimension_numbers<[1], [0], [0], [1], [0, 0, 1, 1], [], []>} : vector<8x128xf32>, vector<128x256xf32>, vector<8x256xf32> -> vector<8x256xf32>
    %8 = arith.addf %7, %5 : vector<8x256xf32>
    %9 = vector.extract_strided_slice %8 {offsets = [0, 128], sizes = [8, 128], strides = [1, 1]} : vector<8x256xf32> to vector<8x128xf32>
    %10 = arith.index_cast %c0_i32 : i32 to index
    %c0_5 = arith.constant 0 : index
    %c0_6 = arith.constant 0 : index
    %11 = vector.load %arg7[%10, %c0_5, %c0_6] : memref<3x8x128xf32, #tpu.memory_space<vmem>>, vector<1x8x128xf32>
    %12 = vector.shape_cast %11 : vector<1x8x128xf32> to vector<8x128xf32>
    %13 = vector.shape_cast %9 : vector<8x128xf32> to vector<1x8x128xf32>
    tpu.vector_store %arg7[%10, %c0_5, %c0_6], %13 {strides = array<i32>} : memref<3x8x128xf32, #tpu.memory_space<vmem>>, vector<1x8x128xf32>,
    %14 = vector.extract_strided_slice %8 {offsets = [0, 0], sizes = [8, 128], strides = [1, 1]} : vector<8x256xf32> to vector<8x128xf32>
    %c1_i32 = arith.constant 1 : i32
    %15 = arith.index_cast %c1_i32 : i32 to index
    %16 = memref.load %arg1[%15] : memref<3xi32, #tpu.memory_space<smem>>
    %17 = arith.index_cast %16 : i32 to index
    %c0_7 = arith.constant 0 : index
    %c0_8 = arith.constant 0 : index
    %18 = vector.load %arg3[%17, %c0_7, %c0_8] : memref<57x8x256xf32, #tpu.memory_space<vmem>>, vector<1x8x256xf32>
    %19 = vector.shape_cast %18 : vector<1x8x256xf32> to vector<8x256xf32>
    %c0_9 = arith.constant 0 : index
    %c0_10 = arith.constant 0 : index
    %20 = vector.load %arg4[%c0_9, %c0_10] : memref<128x256xf32, #tpu.memory_space<vmem>>, vector<128x256xf32>
    %cst_11 = arith.constant dense<0.000000e+00> : vector<8x256xf32>
    %21 = tpu.matmul %14, %20, %cst_11 {dimension_numbers = #tpu.dot_dimension_numbers<[1], [0], [0], [1], [0, 0, 1, 1], [], []>} : vector<8x128xf32>, vector<128x256xf32>, vector<8x256xf32> -> vector<8x256xf32>
    %22 = arith.addf %21, %19 : vector<8x256xf32>
    %23 = vector.extract_strided_slice %22 {offsets = [0, 128], sizes = [8, 128], strides = [1, 1]} : vector<8x256xf32> to vector<8x128xf32>
    %24 = arith.index_cast %c1_i32 : i32 to index
    %c0_12 = arith.constant 0 : index
    %c0_13 = arith.constant 0 : index
    %25 = vector.load %arg7[%24, %c0_12, %c0_13] : memref<3x8x128xf32, #tpu.memory_space<vmem>>, vector<1x8x128xf32>
    %26 = vector.shape_cast %25 : vector<1x8x128xf32> to vector<8x128xf32>
    %27 = vector.shape_cast %23 : vector<8x128xf32> to vector<1x8x128xf32>
    tpu.vector_store %arg7[%24, %c0_12, %c0_13], %27 {strides = array<i32>} : memref<3x8x128xf32, #tpu.memory_space<vmem>>, vector<1x8x128xf32>,
    %28 = vector.extract_strided_slice %22 {offsets = [0, 0], sizes = [8, 128], strides = [1, 1]} : vector<8x256xf32> to vector<8x128xf32>
    %c2_i32 = arith.constant 2 : i32
    %29 = arith.index_cast %c2_i32 : i32 to index
    %30 = memref.load %arg1[%29] : memref<3xi32, #tpu.memory_space<smem>>
    %31 = arith.index_cast %30 : i32 to index
    %c0_14 = arith.constant 0 : index
    %c0_15 = arith.constant 0 : index
    %32 = vector.load %arg3[%31, %c0_14, %c0_15] : memref<57x8x256xf32, #tpu.memory_space<vmem>>, vector<1x8x256xf32>
    %33 = vector.shape_cast %32 : vector<1x8x256xf32> to vector<8x256xf32>
    %c0_16 = arith.constant 0 : index
    %c0_17 = arith.constant 0 : index
    %34 = vector.load %arg4[%c0_16, %c0_17] : memref<128x256xf32, #tpu.memory_space<vmem>>, vector<128x256xf32>
    %cst_18 = arith.constant dense<0.000000e+00> : vector<8x256xf32>
    %35 = tpu.matmul %28, %34, %cst_18 {dimension_numbers = #tpu.dot_dimension_numbers<[1], [0], [0], [1], [0, 0, 1, 1], [], []>} : vector<8x128xf32>, vector<128x256xf32>, vector<8x256xf32> -> vector<8x256xf32>
    %36 = arith.addf %35, %33 : vector<8x256xf32>
    %37 = vector.extract_strided_slice %36 {offsets = [0, 128], sizes = [8, 128], strides = [1, 1]} : vector<8x256xf32> to vector<8x128xf32>
    %38 = arith.index_cast %c2_i32 : i32 to index
    %c0_19 = arith.constant 0 : index
    %c0_20 = arith.constant 0 : index
    %39 = vector.load %arg7[%38, %c0_19, %c0_20] : memref<3x8x128xf32, #tpu.memory_space<vmem>>, vector<1x8x128xf32>
    %40 = vector.shape_cast %39 : vector<1x8x128xf32> to vector<8x128xf32>
    %41 = vector.shape_cast %37 : vector<8x128xf32> to vector<1x8x128xf32>
    tpu.vector_store %arg7[%38, %c0_19, %c0_20], %41 {strides = array<i32>} : memref<3x8x128xf32, #tpu.memory_space<vmem>>, vector<1x8x128xf32>,
    %42 = vector.extract_strided_slice %36 {offsets = [0, 0], sizes = [8, 128], strides = [1, 1]} : vector<8x256xf32> to vector<8x128xf32>
    %c3_i32 = arith.constant 3 : i32
    %c0_21 = arith.constant 0 : index
    %c0_22 = arith.constant 0 : index
    %43 = vector.load %arg6[%c0_21, %c0_22] : memref<8x128xf32, #tpu.memory_space<vmem>>, vector<8x128xf32>
    tpu.vector_store %arg6[%c0_21, %c0_22], %42 {strides = array<i32>} : memref<8x128xf32, #tpu.memory_space<vmem>>, vector<8x128xf32>,
    %c0_23 = arith.constant 0 : index
    %c0_24 = arith.constant 0 : index
    %c0_25 = arith.constant 0 : index
    %44 = vector.load %arg7[%c0_23, %c0_24, %c0_25] : memref<3x8x128xf32, #tpu.memory_space<vmem>>, vector<3x8x128xf32>
    %cst_26 = arith.constant dense<0xFF800000> : vector<3x8xf32>
    %45 = vector.multi_reduction <maximumf>, %44, %cst_26 [2] : vector<3x8x128xf32> to vector<3x8xf32>
    %46 = vector.shape_cast %45 : vector<3x8xf32> to vector<3x8x1xf32>
    %47 = vector.broadcast %46 : vector<3x8x1xf32> to vector<3x8x128xf32>
    %48 = arith.subf %44, %47 : vector<3x8x128xf32>
    %49 = math.exp %48 : vector<3x8x128xf32>
    %cst_27 = arith.constant dense<0.000000e+00> : vector<3x8xf32>
    %50 = vector.multi_reduction <add>, %49, %cst_27 [2] : vector<3x8x128xf32> to vector<3x8xf32>
    %51 = vector.shape_cast %50 : vector<3x8xf32> to vector<3x8x1xf32>
    %52 = math.log %51 : vector<3x8x1xf32>
    %53 = vector.broadcast %52 : vector<3x8x1xf32> to vector<3x8x128xf32>
    %54 = arith.subf %48, %53 : vector<3x8x128xf32>
    %c0_28 = arith.constant 0 : index
    %c0_29 = arith.constant 0 : index
    %c0_30 = arith.constant 0 : index
    %55 = vector.load %arg5[%c0_28, %c0_29, %c0_30] : memref<3x8x128xf32, #tpu.memory_space<vmem>>, vector<3x8x128xf32>
    tpu.vector_store %arg5[%c0_28, %c0_29, %c0_30], %54 {strides = array<i32>} : memref<3x8x128xf32, #tpu.memory_space<vmem>>, vector<3x8x128xf32>,
    return
  }
  func.func @transform_0(%arg0: i32, %arg1: memref<3xi32, #tpu.memory_space<smem>>) -> (i32, i32) {
    %c0_i32 = arith.constant 0 : i32
    %c0_i32_0 = arith.constant 0 : i32
    %c0_i32_1 = arith.constant 0 : i32
    return %c0_i32, %c0_i32_0 : i32, i32
  }
  func.func @transform_1(%arg0: i32, %arg1: memref<3xi32, #tpu.memory_space<smem>>) -> (i32, i32, i32) {
    %c0_i32 = arith.constant 0 : i32
    %c0_i32_0 = arith.constant 0 : i32
    %c0_i32_1 = arith.constant 0 : i32
    %c0_i32_2 = arith.constant 0 : i32
    return %c0_i32, %c0_i32_0, %c0_i32_1 : i32, i32, i32
  }
  func.func @transform_2(%arg0: i32, %arg1: memref<3xi32, #tpu.memory_space<smem>>) -> (i32, i32) {
    %c0_i32 = arith.constant 0 : i32
    %c0_i32_0 = arith.constant 0 : i32
    %c0_i32_1 = arith.constant 0 : i32
    return %c0_i32, %c0_i32_0 : i32, i32
  }
  func.func @transform_3(%arg0: i32, %arg1: memref<3xi32, #tpu.memory_space<smem>>) -> (i32, i32, i32) {
    %c0_i32 = arith.constant 0 : i32
    %c0_i32_0 = arith.constant 0 : i32
    %c0_i32_1 = arith.constant 0 : i32
    %c0_i32_2 = arith.constant 0 : i32
    return %c0_i32, %c0_i32_0, %c0_i32_1 : i32, i32, i32
  }
  func.func @transform_4(%arg0: i32, %arg1: memref<3xi32, #tpu.memory_space<smem>>) -> (i32, i32) {
    %c0_i32 = arith.constant 0 : i32
    %c0_i32_0 = arith.constant 0 : i32
    %c0_i32_1 = arith.constant 0 : i32
    return %c0_i32, %c0_i32_0 : i32, i32
  }
}

</mosaic_0001>

<bundles_post_ra>
// kernel: rnn_sequence_forward.1
= control target key start
LH: loop header
LB: loop body
LE: loop exit
PB: predicated region body
PF: predicated region fallthrough
CT: control target
= control target key end

     0   :  { %s692_s0 = inlined_call_operand.vmem [shape: s32[3], index: 0, kind: input, shape index: {}]   ;;  %s693_s1 = inlined_call_operand.vmem [shape: f32[8,128], index: 1, kind: input, shape index: {}]   ;;  %s694_s2 = inlined_call_operand.hbm [shape: f32[57,8,256], index: 2, kind: input, shape index: {}]   ;;  %s695_s3 = inlined_call_operand.hbm [shape: f32[128,256], index: 3, kind: input, shape index: {}]   ;;  %s696_s4 = inlined_call_operand.vmem [shape: f32[3,8,128], index: 4, kind: output, shape index: {0}]   ;;  %s697_s5 = inlined_call_operand.vmem [shape: f32[8,128], index: 5, kind: output, shape index: {1}]  }
   0x1   :  { %s11_s20 = sshll.u32 %s692_s0, 4  ;;  %s12_s20 = int_to_ptr.vmem [resolvable:$true] %s11_s20 }
   0x2   :  { %s466_s21 = scalar_lea.vmem %s12_s20, 16  ;;  %p471_p1 = scmp.lt.s32.totalorder %s12_s20, %s12_s20 }
   0x3   :  { %p467_p0 = scmp.ne.s32.totalorder %s12_s20, %s466_s21  ;;  %p472_p2 = scmp.lt.s32.totalorder %s466_s21, %s466_s21 }
   0x5   :  { %p473_p3 = por %p472_p2, %p471_p1 }
   0x7   :  { %p474_p4 = pnand %p473_p3, %p467_p0 }
   0x9   :  { %477 = shalt.err (!%p474_p4)  }
   0xa   :  { %s524_s22 = smov [#allocation4]  }
   0xb   :  { %14 = dma.vmem_to_smem %s12_s20, 16, %s524_s22, [#allocation3] }
   0xc   :  { %518 = dma.done.wait [#allocation3], 16 }
   0xd   :  { %519 = vsyncadd [#allocation3], 4294967280 }
   0xe   :  { %16 = sfence }
   0xf   :  { %17 = vsyncpa [#allocation6], 0 }
  0x10   :  { %18 = vsyncpa [#allocation8], 0  ;;  %s525_s23 = smov [#allocation5]  }
  0x11   :  { %s26_s24 = sshll.u32 %s525_s23, 4  ;;  %s27_s24 = int_to_ptr.vmem [resolvable:$true] %s26_s24 }
  0x12   :  { %s486_s25 = scalar_lea.vmem %s27_s24, 14592  ;;  %p491_p6 = scmp.lt.s32.totalorder %s27_s24, %s27_s24 }
  0x13   :  { %p487_p5 = scmp.ne.s32.totalorder %s27_s24, %s486_s25  ;;  %p492_p7 = scmp.lt.s32.totalorder %s486_s25, %s486_s25 }
  0x15   :  { %p493_p8 = por %p492_p7, %p491_p6 }
  0x17   :  { %p494_p9 = pnand %p493_p8, %p487_p5 }
  0x19   :  { %497 = shalt.err (!%p494_p9)
}
  0x1a   :  { %s526_s0 = smov 256   ;;  %s527_s26 = smov 16  }
  0x1b   :  { %32 = dma.hbm_to_vmem [thread:$0]  %s694_s2, 14592, %s27_s24, [#allocation6], %s526_s0, %s526_s0, %s527_s26  }
  0x1c   :  { %s528_s29 = smov [#allocation7]  }
  0x1d   :  { %s38_s30 = sshll.u32 %s528_s29, 4  ;;  %s39_s30 = int_to_ptr.vmem [resolvable:$true] %s38_s30 }
  0x1e   :  { %s506_s6 = scalar_lea.vmem %s39_s30, 4096  ;;  %p511_p11 = scmp.lt.s32.totalorder %s39_s30, %s39_s30 }
  0x1f   :  { %p507_p10 = scmp.ne.s32.totalorder %s39_s30, %s506_s6  ;;  %p512_p12 = scmp.lt.s32.totalorder %s506_s6, %s506_s6 }
  0x21   :  { %p513_p13 = por %p512_p12, %p511_p11 }
  0x23   :  { %p514_p0 = pnand %p513_p13, %p507_p10 }
  0x25   :  { %517 = shalt.err (!%p514_p0)
}
  0x26   :  { %44 = dma.hbm_to_vmem [thread:$0]  %s695_s3, 4096, %s39_s30, [#allocation8], %s526_s0, %s526_s0, %s527_s26  }
  0x27   :  { %520 = dma.done.wait [#allocation6], 14592  }
  0x28   :  { %521 = vsyncadd [#allocation6], 4294952704 }
  0x29   :  { %522 = dma.done.wait [#allocation8], 4096  }
  0x2a   :  { %523 = vsyncadd [#allocation8], 4294963200  ;;  %v529_v0 = vmov 0.0   ;;  %v571_v1 = vld [vmem:[#allocation7 + $0xf8] sm:$0xff]  ;;  %v573_v2 = vld [vmem:[#allocation7 + $0xf0] sm:$0xff]  ;;  %s439_s11 = sld [smem:[#allocation4 + $0x1]] }
  0x2b   :  { %154 = vmatprep.mubr.f32.mxu0 %v529_v0  ;;  %264 = vmatprep.mubr.f32.mxu1 %v529_v0  ;;  %v575_v3 = vld [vmem:[#allocation7 + $0xe8] sm:$0xff]  ;;  %v578_v4 = vld [vmem:[#allocation7 + $0xe0] sm:$0xff]  ;;  %v582_v5 = vld [vmem:[#allocation7 + $0xd8] sm:$0xff]  ;;  %s442_s14 = sld [smem:[#allocation4 + $0x2]] }
  0x2c   :  { %90 = vmatprep.subr.mxu0 %v571_v1  ;;  %200 = vmatprep.subr.mxu1 %v571_v1  ;;  %v586_v6 = vld [vmem:[#allocation7 + $0xd0] sm:$0xff]  ;;  %v590_v7 = vld [vmem:[#allocation7 + $0xc8] sm:$0xff]  ;;  %v594_v8 = vld [vmem:[#allocation7 + $0xc0] sm:$0xff] }
  0x2d   :  { %91 = vmatpush1.msra.mxu0 %v573_v2  ;;  %201 = vmatpush1.msra.mxu1 %v573_v2  ;;  %v598_v9 = vld [vmem:[#allocation7 + $0xb8] sm:$0xff]  ;;  %v602_v10 = vld [vmem:[#allocation7 + $0xb0] sm:$0xff]  ;;  %v606_v11 = vld [vmem:[#allocation7 + $0xa8] sm:$0xff] }
  0x2e   :  { %92 = vmatprep.subr.mxu0 %v575_v3  ;;  %202 = vmatprep.subr.mxu1 %v575_v3  ;;  %v610_v12 = vld [vmem:[#allocation7 + $0xa0] sm:$0xff]  ;;  %v614_v13 = vld [vmem:[#allocation7 + $0x98] sm:$0xff]  ;;  %v618_v14 = vld [vmem:[#allocation7 + $0x90] sm:$0xff] }
  0x2f   :  { %93 = vmatpush1.msra.mxu0 %v578_v4  ;;  %203 = vmatpush1.msra.mxu1 %v578_v4  ;;  %v622_v15 = vld [vmem:[#allocation7 + $0x88] sm:$0xff]  ;;  %v626_v16 = vld [vmem:[#allocation7 + $0x80] sm:$0xff]  ;;  %v630_v17 = vld [vmem:[#allocation7 + $0x78] sm:$0xff] }
  0x30   :  { %94 = vmatprep.subr.mxu0 %v582_v5  ;;  %204 = vmatprep.subr.mxu1 %v582_v5  ;;  %v634_v18 = vld [vmem:[#allocation7 + $0x70] sm:$0xff]  ;;  %v638_v19 = vld [vmem:[#allocation7 + $0x68] sm:$0xff]  ;;  %v642_v20 = vld [vmem:[#allocation7 + $0x60] sm:$0xff]  ;;  %s446_s12 = sshll.u32 %s439_s11, 4 }
  0x31   :  { %95 = vmatpush1.msra.mxu0 %v586_v6  ;;  %205 = vmatpush1.msra.mxu1 %v586_v6  ;;  %v646_v21 = vld [vmem:[#allocation7 + $0x58] sm:$0xff]  ;;  %v68_v22 = vld [vmem:[#allocation7 + $0x50] sm:$0xff]  ;;  %v67_v23 = vld [vmem:[#allocation7 + $0x48] sm:$0xff]  ;;  %s165_s13 = scalar_lea.vmem [#allocation5], %s446_s12  ;;  %s447_s15 = sshll.u32 %s442_s14, 4 }
  0x32   :  { %96 = vmatprep.subr.mxu0 %v590_v7  ;;  %206 = vmatprep.subr.mxu1 %v590_v7  ;;  %v66_v24 = vld [vmem:[#allocation7 + $0x40] sm:$0xff]  ;;  %v65_v25 = vld [vmem:[#allocation7 + $0x38] sm:$0xff]  ;;  %v64_v26 = vld [vmem:[#allocation7 + $0x30] sm:$0xff]  ;;  %s276_s16 = scalar_lea.vmem [#allocation5], %s447_s15 }
  0x33   :  { %97 = vmatpush1.msra.mxu0 %v594_v8  ;;  %207 = vmatpush1.msra.mxu1 %v594_v8  ;;  %v63_v27 = vld [vmem:[#allocation7 + $0x28] sm:$0xff]  ;;  %v62_v28 = vld [vmem:[#allocation7 + $0x20] sm:$0xff]  ;;  %v61_v29 = vld [vmem:[#allocation7 + $0x18] sm:$0xff] }
  0x34   :  { %98 = vmatprep.subr.mxu0 %v598_v9  ;;  %208 = vmatprep.subr.mxu1 %v598_v9  ;;  %v60_v30 = vld [vmem:[#allocation7 + $0x10] sm:$0xff]  ;;  %v59_v31 = vld [vmem:[#allocation7 + $0x8] sm:$0xff]  ;;  %v58_v32 = vld [vmem:[#allocation7] sm:$0xff] }
  0x35   :  { %99 = vmatpush1.msra.mxu0 %v602_v10  ;;  %209 = vmatpush1.msra.mxu1 %v602_v10  ;;  %v51_v33 = vld [vmem:[%s693_s1] sm:$0xff]  ;;  %s52_s1 = sld [smem:[#allocation4]]  ;;  %v167_v42 = vld [vmem:[%s165_s13 + $0x8] sm:$0xff] }
  0x36   :  { %100 = vmatprep.subr.mxu0 %v606_v11  ;;  %210 = vmatprep.subr.mxu1 %v606_v11  ;;  %v166_v40 = vld [vmem:[%s165_s13] sm:$0xff]  ;;  %v278_v55 = vld [vmem:[%s276_s16 + $0x8] sm:$0xff] }
  0x37   :  { %101 = vmatpush1.msra.mxu0 %v610_v12  ;;  %211 = vmatpush1.msra.mxu1 %v610_v12  ;;  %v277_v53 = vld [vmem:[%s276_s16] sm:$0xff] }
  0x38   :  { %102 = vmatprep.subr.mxu0 %v614_v13  ;;  %212 = vmatprep.subr.mxu1 %v614_v13 }
  0x39   :  { %103 = vmatpush1.msra.mxu0 %v618_v14  ;;  %213 = vmatpush1.msra.mxu1 %v618_v14 }
  0x3a   :  { %104 = vmatprep.subr.mxu0 %v622_v15  ;;  %214 = vmatprep.subr.mxu1 %v622_v15 }
  0x3b   :  { %105 = vmatpush1.msra.mxu0 %v626_v16  ;;  %215 = vmatpush1.msra.mxu1 %v626_v16  ;;  %s445_s9 = sshll.u32 %s52_s1, 4 }
  0x3c   :  { %106 = vmatprep.subr.mxu0 %v630_v17  ;;  %216 = vmatprep.subr.mxu1 %v630_v17  ;;  %s55_s10 = scalar_lea.vmem [#allocation5], %s445_s9 }
  0x3d   :  { %107 = vmatpush1.msra.mxu0 %v634_v18  ;;  %217 = vmatpush1.msra.mxu1 %v634_v18  ;;  %v56_v34 = vld [vmem:[%s55_s10] sm:$0xff]  ;;  %v57_v36 = vld [vmem:[%s55_s10 + $0x8] sm:$0xff] }
  0x3e   :  { %108 = vmatprep.subr.mxu0 %v638_v19  ;;  %218 = vmatprep.subr.mxu1 %v638_v19 }
  0x3f   :  { %109 = vmatpush1.msra.mxu0 %v642_v20  ;;  %219 = vmatpush1.msra.mxu1 %v642_v20 }
  0x40   :  { %110 = vmatprep.subr.mxu0 %v646_v21  ;;  %220 = vmatprep.subr.mxu1 %v646_v21 }
  0x41   :  { %111 = vmatpush1.msra.mxu0 %v68_v22  ;;  %221 = vmatpush1.msra.mxu1 %v68_v22 }
  0x42   :  { %112 = vmatprep.subr.mxu0 %v67_v23  ;;  %222 = vmatprep.subr.mxu1 %v67_v23 }
  0x43   :  { %113 = vmatpush1.msra.mxu0 %v66_v24  ;;  %223 = vmatpush1.msra.mxu1 %v66_v24 }
  0x44   :  { %114 = vmatprep.subr.mxu0 %v65_v25  ;;  %224 = vmatprep.subr.mxu1 %v65_v25 }
  0x45   :  { %115 = vmatpush1.msra.mxu0 %v64_v26  ;;  %225 = vmatpush1.msra.mxu1 %v64_v26 }
  0x46   :  { %116 = vmatprep.subr.mxu0 %v63_v27  ;;  %226 = vmatprep.subr.mxu1 %v63_v27 }
  0x47   :  { %117 = vmatpush1.msra.mxu0 %v62_v28  ;;  %227 = vmatpush1.msra.mxu1 %v62_v28 }
  0x48   :  { %118 = vmatprep.subr.mxu0 %v61_v29  ;;  %228 = vmatprep.subr.mxu1 %v61_v29 }
  0x49   :  { %119 = vmatpush1.msra.mxu0 %v60_v30  ;;  %229 = vmatpush1.msra.mxu1 %v60_v30 }
  0x4a   :  { %120 = vmatprep.subr.mxu0 %v59_v31  ;;  %230 = vmatprep.subr.mxu1 %v59_v31 }
  0x4b   :  { %121 = vmatpush1.msra.mxu0 %v58_v32  ;;  %231 = vmatpush1.msra.mxu1 %v58_v32 }
  0x4c   :  { %155 = vmatmul.mubr.f32.vlgmr.msra.gmra.mxu0 %v51_v33  ;;  %311 = vmatprep.subr.mxu0 %v571_v1 }
  0x4d   :  { %312 = vmatpush1.msra.mxu0 %v573_v2  ;;  %375 = vmatprep.mubr.f32.mxu0 %v529_v0 }
  0x4e   :  { %313 = vmatprep.subr.mxu0 %v575_v3 }
  0x4f   :  { %314 = vmatpush1.msra.mxu0 %v578_v4 }
  0x50   :  { %315 = vmatprep.subr.mxu0 %v582_v5 }
  0x51   :  { %316 = vmatpush1.msra.mxu0 %v586_v6 }
  0x52   :  { %317 = vmatprep.subr.mxu0 %v590_v7 }
  0x53   :  { %318 = vmatpush1.msra.mxu0 %v594_v8 }
  0x54   :  { %319 = vmatprep.subr.mxu0 %v598_v9 }
  0x55   :  { %320 = vmatpush1.msra.mxu0 %v602_v10 }
  0x56   :  { %321 = vmatprep.subr.mxu0 %v606_v11 }
  0x57   :  { %322 = vmatpush1.msra.mxu0 %v610_v12 }
  0x58   :  { %323 = vmatprep.subr.mxu0 %v614_v13 }
  0x59   :  { %324 = vmatpush1.msra.mxu0 %v618_v14 }
  0x5a   :  { %325 = vmatprep.subr.mxu0 %v622_v15 }
  0x5b   :  { %326 = vmatpush1.msra.mxu0 %v626_v16 }
  0x5c   :  { %327 = vmatprep.subr.mxu0 %v630_v17 }
  0x5d   :  { %328 = vmatpush1.msra.mxu0 %v634_v18 }
  0x5e   :  { %329 = vmatprep.subr.mxu0 %v638_v19 }
  0x5f   :  { %330 = vmatpush1.msra.mxu0 %v642_v20 }
  0x60   :  { %331 = vmatprep.subr.mxu0 %v646_v21 }
  0x61   :  { %332 = vmatpush1.msra.mxu0 %v68_v22 }
  0x62   :  { %333 = vmatprep.subr.mxu0 %v67_v23 }
  0x63   :  { %334 = vmatpush1.msra.mxu0 %v66_v24 }
  0x64   :  { %335 = vmatprep.subr.mxu0 %v65_v25 }
  0x65   :  { %336 = vmatpush1.msra.mxu0 %v64_v26 }
  0x66   :  { %337 = vmatprep.subr.mxu0 %v63_v27 }
  0x67   :  { %338 = vmatpush1.msra.mxu0 %v62_v28 }
  0x68   :  { %339 = vmatprep.subr.mxu0 %v61_v29 }
  0x69   :  { %340 = vmatpush1.msra.mxu0 %v60_v30 }
  0x6a   :  { %341 = vmatprep.subr.mxu0 %v59_v31 }
  0x6b   :  { %342 = vmatpush1.msra.mxu0 %v58_v32 }
 0x10c   :  { %v156_v35 = vpop.f32.mrf.mxu0 }
 0x10d   :  { %v157_v37 = vadd.f32 %v156_v35, %v56_v34 }
 0x10e   :  { %v158_v38 = vpop.f32.mrf.mxu0 }
 0x10f   :  { %v159_v39 = vadd.f32 %v158_v38, %v57_v36  ;;  %265 = vmatmul.mubr.f32.vlgmr.msra.gmra.mxu1 %v157_v37 }
 0x111   :  { %388 = vmax.xlane.f32.xlu0 %v159_v39 }
 0x19a   :  { %v389_v46 = vpop.xlane.xlu0 %388 }
 0x19b   :  { %v394_v51 = vsub.f32 %v159_v39, %v389_v46 }
 0x19d   :  { %v397_v52 = vmul.f32 1.442695, %v394_v51 }
 0x1cf   :  { %v266_v41 = vpop.f32.mrf.mxu1 }
 0x1d0   :  { %v267_v43 = vadd.f32 %v266_v41, %v166_v40 }
 0x1d1   :  { %v268_v44 = vpop.f32.mrf.mxu1 }
 0x1d2   :  { %v269_v45 = vadd.f32 %v268_v44, %v167_v42  ;;  %376 = vmatmul.mubr.f32.vlgmr.msra.gmra.mxu0 %v267_v43 }
 0x1d4   :  { %390 = vmax.xlane.f32.xlu0 %v269_v45 }
 0x25d   :  { %v391_v47 = vpop.xlane.xlu0 %390 }
 0x25e   :  { %v395_v48 = vsub.f32 %v269_v45, %v391_v47 }
 0x260   :  { %v399_v49 = vmul.f32 1.442695, %v395_v48 }
 0x262   :  { %454 = vpow2.f32 %v399_v49 }
 0x263   :  { %456 = vpow2.f32 %v397_v52 }
 0x26f   :  { %v455_v50 = vpop.eup %454 }
 0x270   :  { %405 = vadd.xlane.f32.xlu0 %v455_v50  ;;  %v457_v59 = vpop.eup %456 }
 0x292   :  { %v377_v54 = vpop.f32.mrf.mxu0 }
 0x293   :  { %v378_v56 = vadd.f32 %v377_v54, %v277_v53 }
 0x294   :  { %v379_v57 = vpop.f32.mrf.mxu0 }
 0x295   :  { %384 = vst [vmem:[%s697_s5] sm:$0xff] %v378_v56  ;;  %v380_v58 = vadd.f32 %v379_v57, %v278_v55 }
 0x297   :  { %392 = vmax.xlane.f32.xlu1 %v380_v58 }
 0x29b   :  { %403 = vadd.xlane.f32.xlu1 %v457_v59 }
 0x2f9   :  { %v406_v60 = vpop.xlane.xlu0 %405 }
 0x2fa   :  { %458 = vlog2.f32 %v406_v60 }
 0x307   :  { %v459_v61 = vpop.eup %458 }
 0x308   :  { %v412_v62 = vmul.f32 0.6931472, %v459_v61 }
 0x30a   :  { %v416_v63 = vsub.f32 %v395_v48, %v412_v62 }
 0x30c   :  { %419 = vst [vmem:[%s696_s4 + $0x8] sm:$0xff] %v416_v63 }
 0x320   :  { %v393_v0 = vpop.xlane.xlu1 %392 }
 0x321   :  { %v396_v1 = vsub.f32 %v380_v58, %v393_v0 }
 0x323   :  { %v401_v2 = vmul.f32 1.442695, %v396_v1 }
 0x324   :  { %v404_v3 = vpop.xlane.xlu1 %403 }
 0x325   :  { %460 = vpow2.f32 %v401_v2 }
 0x326   :  { %462 = vlog2.f32 %v404_v3 }
 0x332   :  { %v461_v4 = vpop.eup %460 }
 0x333   :  { %v463_v5 = vpop.eup %462  ;;  %407 = vadd.xlane.f32.xlu1 %v461_v4 }
 0x334   :  { %v410_v6 = vmul.f32 0.6931472, %v463_v5 }
 0x336   :  { %v415_v7 = vsub.f32 %v394_v51, %v410_v6 }
 0x338   :  { %418 = vst [vmem:[%s696_s4] sm:$0xff] %v415_v7 }
 0x3bc   :  { %v408_v8 = vpop.xlane.xlu1 %407 }
 0x3bd   :  { %464 = vlog2.f32 %v408_v8 }
 0x3ca   :  { %v465_v9 = vpop.eup %464 }
 0x3cb   :  { %v414_v10 = vmul.f32 0.6931472, %v465_v9 }
 0x3cd   :  { %v417_v11 = vsub.f32 %v396_v1, %v414_v10 }
 0x3cf   :  { %420 = vst [vmem:[%s696_s4 + $0x10] sm:$0xff] %v417_v11 }
 0x3d0   :  { %429 = vsyncpa [#allocation6], 1 }
 0x3d1   :  { %430 = vsyncpa [#allocation8], 1 }

</bundles_post_ra>
